<compile_context>
chip_gen: v7x
topology: tpu7x:2x2x1
jax: 0.10.0
libtpu: 0.0.40
codegen_flags: <defaults>
</compile_context>

<pallas_src>
import jax
import jax.numpy as jnp
from jax.experimental import pallas as pl
from jax.experimental.pallas import tpu as pltpu

_SUB = 8  # f32 sublane count


def _round_up(x, m):
    return ((x + m - 1) // m) * m


def qnet_kernel(x_ref, w1_ref, b1_ref, w2_ref, b2_ref, w3_ref, b3_ref, out_ref):
    x = x_ref[...]                                              # (TILE_B, S) f32

    # fc1 + ReLU (MXU, f32 accumulation)
    h1 = jnp.dot(x, w1_ref[...], preferred_element_type=jnp.float32) + b1_ref[...]
    h1 = jnp.maximum(h1, 0.0)

    # fc2 + ReLU
    h2 = jnp.dot(h1, w2_ref[...], preferred_element_type=jnp.float32) + b2_ref[...]
    h2 = jnp.maximum(h2, 0.0)

    # fc3 (no activation) -- narrow (action_size-wide) store
    out = jnp.dot(h2, w3_ref[...], preferred_element_type=jnp.float32) + b3_ref[...]
    out_ref[...] = out.astype(out_ref.dtype)


def qnetwork_forward(state, params, *, tile_b=1024):
    """state: (B, state_size) f32.  params: dict of w1,b1,w2,b2,w3,b3 (f32,
    weights (in, out), biases (1, out))."""
    w1, b1, w2, b2, w3, b3 = (params[k] for k in ("w1", "b1", "w2", "b2", "w3", "b3"))
    batch, state_size = state.shape
    hidden = w1.shape[1]
    action_size = w3.shape[1]

    # --- Batch tiling ----------------------------------------------------
    # Sublane-aligned tile; ensure >=2 grid steps when the batch allows it so
    # v7x can shard the "parallel" axis across both TensorCores and the
    # pipeline can overlap DMA(i+1) with compute(i).
    batch_p8 = _round_up(batch, _SUB)
    tile = min(tile_b, batch_p8)
    tile = _round_up(tile, _SUB)
    if batch > _SUB and pl.cdiv(batch_p8, tile) < 2:
        tile = max(_SUB, _round_up(pl.cdiv(batch_p8, 2), _SUB))
    batch_p = _round_up(batch, tile)
    grid = (batch_p // tile,)

    # Only the batch rows ever get padded (cheap: real-width state), and only
    # when needed.  Padded rows are discarded by the final row slice.
    if batch_p != batch:
        x = jnp.pad(state, ((0, batch_p - batch), (0, 0)))
    else:
        x = state

    def resident(shape):
        # Weights/biases: same block every grid step -> stay resident in VMEM.
        return pl.BlockSpec(shape, lambda i: (0, 0))

    flops = 2 * batch_p * (state_size * hidden + hidden * hidden + hidden * action_size)
    param_bytes = sum(4 * a.size for a in (w1, b1, w2, b2, w3, b3))
    bytes_accessed = 4 * batch_p * (state_size + action_size) + param_bytes

    out_p = pl.pallas_call(
        qnet_kernel,
        out_shape=jax.ShapeDtypeStruct((batch_p, action_size), jnp.float32),
        grid=grid,
        in_specs=[
            pl.BlockSpec((tile, state_size), lambda i: (i, 0)),   # state: tiled over batch
            resident((state_size, hidden)),                       # w1
            resident((1, hidden)),                                # b1
            resident((hidden, hidden)),                           # w2
            resident((1, hidden)),                                # b2
            resident((hidden, action_size)),                      # w3
            resident((1, action_size)),                           # b3
        ],
        out_specs=pl.BlockSpec((tile, action_size), lambda i: (i, 0)),
        compiler_params=pltpu.CompilerParams(
            dimension_semantics=("parallel",),                    # megacore sharding on v7x
            vmem_limit_bytes=8 * 1024 * 1024,                     # blocks are tiny; ample headroom
        ),
        cost_estimate=pl.CostEstimate(
            flops=flops, transcendentals=0, bytes_accessed=bytes_accessed),
    )(x, w1, b1, w2, b2, w3, b3)

    return out_p if batch_p == batch else out_p[:batch]


def init_qnetwork_params(key, state_size, action_size, hidden=64):
    """Deterministic init matching nn.Linear's default: U(-1/sqrt(fan_in), +1/sqrt(fan_in)).
    Biases are stored as (1, out) so the forward pass does zero per-call reshaping."""
    def linear_init(k, fan_in, fan_out):
        kw, kb = jax.random.split(k)
        bound = 1.0 / jnp.sqrt(jnp.float32(fan_in))
        w = jax.random.uniform(kw, (fan_in, fan_out), jnp.float32, -bound, bound)
        b = jax.random.uniform(kb, (1, fan_out), jnp.float32, -bound, bound)
        return w, b

    k1, k2, k3 = jax.random.split(key, 3)
    w1, b1 = linear_init(k1, state_size, hidden)
    w2, b2 = linear_init(k2, hidden, hidden)
    w3, b3 = linear_init(k3, hidden, action_size)
    return {"w1": w1, "b1": b1, "w2": w2, "b2": b2, "w3": w3, "b3": b3}


def qnetwork_reference(state, params):
    """Pure-JAX f32 reference for correctness checking."""
    h1 = jnp.maximum(state @ params["w1"] + params["b1"], 0.0)
    h2 = jnp.maximum(h1 @ params["w2"] + params["b2"], 0.0)
    return h2 @ params["w3"] + params["b3"]


if __name__ == "__main__":
    key = jax.random.PRNGKey(0)
    state_size, action_size = 8, 4

    k_params, k_state1, k_state2 = jax.random.split(key, 3)
    params = init_qnetwork_params(k_params, state_size, action_size)

    # Small batch (grid collapses to a single step).
    state_small = jax.random.normal(k_state1, (2, state_size), jnp.float32)
    ref_small = qnetwork_reference(state_small, params)
    out_small = jax.block_until_ready(qnetwork_forward(state_small, params))
    assert out_small.shape == (2, action_size)
    assert jnp.allclose(out_small, ref_small, atol=1e-4, rtol=1e-4)

    # Larger, unaligned batch: exercises row padding + multi-step grid
    # (>=2 steps -> v7x megacore sharding / pipelined DMA).
    state_big = jax.random.normal(k_state2, (300, state_size), jnp.float32)
    ref_big = qnetwork_reference(state_big, params)
    out_big = jax.block_until_ready(qnetwork_forward(state_big, params))
    assert out_big.shape == (300, action_size)
    assert jnp.allclose(out_big, ref_big, atol=1e-4, rtol=1e-4)

    print("KERNEL_OK")
</pallas_src>

<mosaic_0001>
module attributes {stable_mosaic.version = 11 : i64} {
  func.func @qnet_kernel(%arg0: i32, %arg1: memref<8x8xf32, #tpu.memory_space<vmem>>, %arg2: memref<8x64xf32, #tpu.memory_space<vmem>>, %arg3: memref<1x64xf32, #tpu.memory_space<vmem>>, %arg4: memref<64x64xf32, #tpu.memory_space<vmem>>, %arg5: memref<1x64xf32, #tpu.memory_space<vmem>>, %arg6: memref<64x4xf32, #tpu.memory_space<vmem>>, %arg7: memref<1x4xf32, #tpu.memory_space<vmem>>, %arg8: memref<8x4xf32, #tpu.memory_space<vmem>>) attributes {dimension_semantics = [#tpu.dimension_semantics<parallel>], iteration_bounds = array<i64: 1>, scalar_prefetch = 0 : i64, scratch_operands = 0 : i64, tpu.core_type = #tpu.core_type<tc>, window_params = [{transform_indices = @transform_0, window_bounds = array<i64: 8, 8>}, {pipeline_mode = #tpu.pipeline_mode<synchronous>, transform_indices = @transform_1, window_bounds = array<i64: 8, 64>}, {pipeline_mode = #tpu.pipeline_mode<synchronous>, transform_indices = @transform_2, window_bounds = array<i64: 1, 64>}, {pipeline_mode = #tpu.pipeline_mode<synchronous>, transform_indices = @transform_3, window_bounds = array<i64: 64, 64>}, {pipeline_mode = #tpu.pipeline_mode<synchronous>, transform_indices = @transform_4, window_bounds = array<i64: 1, 64>}, {pipeline_mode = #tpu.pipeline_mode<synchronous>, transform_indices = @transform_5, window_bounds = array<i64: 64, 4>}, {pipeline_mode = #tpu.pipeline_mode<synchronous>, transform_indices = @transform_6, window_bounds = array<i64: 1, 4>}, {transform_indices = @transform_7, window_bounds = array<i64: 8, 4>}]} {
    %c0 = arith.constant 0 : index
    %c0_0 = arith.constant 0 : index
    %0 = vector.load %arg1[%c0, %c0_0] : memref<8x8xf32, #tpu.memory_space<vmem>>, vector<8x8xf32>
    %c0_1 = arith.constant 0 : index
    %c0_2 = arith.constant 0 : index
    %1 = vector.load %arg2[%c0_1, %c0_2] : memref<8x64xf32, #tpu.memory_space<vmem>>, vector<8x64xf32>
    %cst = arith.constant dense<0.000000e+00> : vector<8x64xf32>
    %2 = tpu.matmul %0, %1, %cst {dimension_numbers = #tpu.dot_dimension_numbers<[1], [0], [0], [1], [0, 0, 1, 1], [], []>} : vector<8x8xf32>, vector<8x64xf32>, vector<8x64xf32> -> vector<8x64xf32>
    %c0_3 = arith.constant 0 : index
    %c0_4 = arith.constant 0 : index
    %3 = vector.load %arg3[%c0_3, %c0_4] : memref<1x64xf32, #tpu.memory_space<vmem>>, vector<1x64xf32>
    %4 = vector.broadcast %3 : vector<1x64xf32> to vector<8x64xf32>
    %5 = arith.addf %2, %4 : vector<8x64xf32>
    %cst_5 = arith.constant 0.000000e+00 : f32
    %6 = vector.broadcast %cst_5 : f32 to vector<8x64xf32>
    %7 = arith.maximumf %5, %6 : vector<8x64xf32>
    %c0_6 = arith.constant 0 : index
    %c0_7 = arith.constant 0 : index
    %8 = vector.load %arg4[%c0_6, %c0_7] : memref<64x64xf32, #tpu.memory_space<vmem>>, vector<64x64xf32>
    %cst_8 = arith.constant dense<0.000000e+00> : vector<8x64xf32>
    %9 = tpu.matmul %7, %8, %cst_8 {dimension_numbers = #tpu.dot_dimension_numbers<[1], [0], [0], [1], [0, 0, 1, 1], [], []>} : vector<8x64xf32>, vector<64x64xf32>, vector<8x64xf32> -> vector<8x64xf32>
    %c0_9 = arith.constant 0 : index
    %c0_10 = arith.constant 0 : index
    %10 = vector.load %arg5[%c0_9, %c0_10] : memref<1x64xf32, #tpu.memory_space<vmem>>, vector<1x64xf32>
    %11 = vector.broadcast %10 : vector<1x64xf32> to vector<8x64xf32>
    %12 = arith.addf %9, %11 : vector<8x64xf32>
    %cst_11 = arith.constant 0.000000e+00 : f32
    %13 = vector.broadcast %cst_11 : f32 to vector<8x64xf32>
    %14 = arith.maximumf %12, %13 : vector<8x64xf32>
    %c0_12 = arith.constant 0 : index
    %c0_13 = arith.constant 0 : index
    %15 = vector.load %arg6[%c0_12, %c0_13] : memref<64x4xf32, #tpu.memory_space<vmem>>, vector<64x4xf32>
    %cst_14 = arith.constant dense<0.000000e+00> : vector<8x4xf32>
    %16 = tpu.matmul %14, %15, %cst_14 {dimension_numbers = #tpu.dot_dimension_numbers<[1], [0], [0], [1], [0, 0, 1, 1], [], []>} : vector<8x64xf32>, vector<64x4xf32>, vector<8x4xf32> -> vector<8x4xf32>
    %c0_15 = arith.constant 0 : index
    %c0_16 = arith.constant 0 : index
    %17 = vector.load %arg7[%c0_15, %c0_16] : memref<1x4xf32, #tpu.memory_space<vmem>>, vector<1x4xf32>
    %18 = vector.broadcast %17 : vector<1x4xf32> to vector<8x4xf32>
    %19 = arith.addf %16, %18 : vector<8x4xf32>
    %c0_17 = arith.constant 0 : index
    %c0_18 = arith.constant 0 : index
    %20 = vector.load %arg8[%c0_17, %c0_18] : memref<8x4xf32, #tpu.memory_space<vmem>>, vector<8x4xf32>
    tpu.vector_store %arg8[%c0_17, %c0_18], %19 {strides = array<i32>} : memref<8x4xf32, #tpu.memory_space<vmem>>, vector<8x4xf32>,
    return
  }
  func.func @transform_0(%arg0: i32) -> (i32, i32) {
    %c0_i32 = arith.constant 0 : i32
    %c0_i32_0 = arith.constant 0 : i32
    return %arg0, %c0_i32 : i32, i32
  }
  func.func @transform_1(%arg0: i32) -> (i32, i32) {
    %c0_i32 = arith.constant 0 : i32
    %c0_i32_0 = arith.constant 0 : i32
    %c0_i32_1 = arith.constant 0 : i32
    return %c0_i32, %c0_i32_0 : i32, i32
  }
  func.func @transform_2(%arg0: i32) -> (i32, i32) {
    %c0_i32 = arith.constant 0 : i32
    %c0_i32_0 = arith.constant 0 : i32
    %c0_i32_1 = arith.constant 0 : i32
    return %c0_i32, %c0_i32_0 : i32, i32
  }
  func.func @transform_3(%arg0: i32) -> (i32, i32) {
    %c0_i32 = arith.constant 0 : i32
    %c0_i32_0 = arith.constant 0 : i32
    %c0_i32_1 = arith.constant 0 : i32
    return %c0_i32, %c0_i32_0 : i32, i32
  }
  func.func @transform_4(%arg0: i32) -> (i32, i32) {
    %c0_i32 = arith.constant 0 : i32
    %c0_i32_0 = arith.constant 0 : i32
    %c0_i32_1 = arith.constant 0 : i32
    return %c0_i32, %c0_i32_0 : i32, i32
  }
  func.func @transform_5(%arg0: i32) -> (i32, i32) {
    %c0_i32 = arith.constant 0 : i32
    %c0_i32_0 = arith.constant 0 : i32
    %c0_i32_1 = arith.constant 0 : i32
    return %c0_i32, %c0_i32_0 : i32, i32
  }
  func.func @transform_6(%arg0: i32) -> (i32, i32) {
    %c0_i32 = arith.constant 0 : i32
    %c0_i32_0 = arith.constant 0 : i32
    %c0_i32_1 = arith.constant 0 : i32
    return %c0_i32, %c0_i32_0 : i32, i32
  }
  func.func @transform_7(%arg0: i32) -> (i32, i32) {
    %c0_i32 = arith.constant 0 : i32
    %c0_i32_0 = arith.constant 0 : i32
    return %arg0, %c0_i32 : i32, i32
  }
}

</mosaic_0001>

<bundles_post_ra>
// kernel: tpu_custom_call.1
= control target key start
LH: loop header
LB: loop body
LE: loop exit
PB: predicated region body
PF: predicated region fallthrough
CT: control target
= control target key end

     0   :  { %12 = vsyncpa [#allocation3], 0  ;;  %s428_s24 = smov [#allocation2]   ;;  %s550_s0 = inlined_call_operand.vmem [shape: f32[8,8], index: 0, kind: input, shape index: {}]   ;;  %s551_s1 = inlined_call_operand.hbm [shape: f32[8,64], index: 1, kind: input, shape index: {}]   ;;  %s552_s2 = inlined_call_operand.vmem [shape: f32[1,64], index: 2, kind: input, shape index: {}]   ;;  %s553_s3 = inlined_call_operand.vmem [shape: f32[64,64], index: 3, kind: input, shape index: {}]   ;;  %s554_s4 = inlined_call_operand.vmem [shape: f32[1,64], index: 4, kind: input, shape index: {}]   ;;  %s555_s5 = inlined_call_operand.vmem [shape: f32[64,4], index: 5, kind: input, shape index: {}]   ;;  %s556_s6 = inlined_call_operand.vmem [shape: f32[1,4], index: 6, kind: input, shape index: {}]   ;;  %s557_s7 = inlined_call_operand.vmem [shape: f32[8,4], index: 7, kind: output, shape index: {}]  }
   0x1   :  { %s21_s25 = sshll.u32 %s428_s24, 4  ;;  %s404_s28 = scalar_lea.hbm %s551_s1, 128  ;;  %s22_s25 = int_to_ptr.vmem [resolvable:$true] %s21_s25 }
   0x2   :  { %p405_p0 = scmp.ne.s32.totalorder %s551_s1, %s404_s28  ;;  %p408_p1 = scmp.lt.u32.totalorder %s404_s28, %s551_s1 }
   0x4   :  { %p410_p2 = pnand %p408_p1, %p405_p0 }
   0x6   :  { %413 = shalt.err (!%p410_p2)
}
   0x7   :  { %s414_s10 = scalar_lea.vmem %s22_s25, 128  ;;  %p419_p4 = scmp.lt.s32.totalorder %s22_s25, %s22_s25 }
   0x8   :  { %p415_p3 = scmp.ne.s32.totalorder %s22_s25, %s414_s10  ;;  %p420_p5 = scmp.lt.s32.totalorder %s414_s10, %s414_s10 }
   0xa   :  { %p421_p6 = por %p420_p5, %p419_p4 }
   0xc   :  { %p422_p7 = pnand %p421_p6, %p415_p3 }
   0xe   :  { %425 = shalt.err (!%p422_p7)
}
   0xf   :  { %24 = dma.hbm_to_vmem [thread:$0]  %s551_s1, 128, %s22_s25, [#allocation3]  }
  0x10   :  { %426 = dma.done.wait [#allocation3], 128  }
  0x11   :  { %427 = vsyncadd [#allocation3], 4294967168  ;;  %v429_v0 = vmov 0.0   ;;  %vm430_vm0 = vmmov 0   ;;  %v431_v1 = vmov 0.0|0.0   ;;  %vm47_vm1 = vcmask 64512  }
  0x12   :  { %333 = vmatprep.subr.mxu0 %v429_v0  ;;  %335 = vmatprep.mubr.msk.f32.mxu0 %vm430_vm0, %v429_v0  ;;  %v39_v2 = vld [vmem:[#allocation2] sm:$0xff]  ;;  %v123_v5 = vld [vmem:[%s553_s3 + $0x8] sm:$0xff]  ;;  %v124_v6 = vld [vmem:[%s553_s3 + $0x10] sm:$0xff]  ;;  %vm137_vm2 = vcmask 523264   ;;  %vm300_vm3 = vcmask 31744  }
  0x13   :  { %376 = vmatprep.subr.bf16.mxu1 %v431_v1  ;;  %354 = vmatprep.mubr.msk.f32.mxu1 %vm430_vm0, %v429_v0  ;;  %v38_v3 = vld [vmem:[%s550_s0] sm:$0xff]  ;;  %v125_v7 = vld [vmem:[%s553_s3 + $0x18] sm:$0xff]  ;;  %v127_v11 = vld [vmem:[%s553_s3 + $0x28] sm:$0xff] }
  0x14   :  { %v122_v4 = vld [vmem:[%s553_s3] sm:$0xff]  ;;  %334 = vmatpush3.msra.mxu0 %v39_v2  ;;  %v380_v9 = vpack.c.bf16 %v125_v7, %v124_v6  ;;  %v128_v13 = vld [vmem:[%s553_s3 + $0x30] sm:$0xff]  ;;  %v129_v14 = vld [vmem:[%s553_s3 + $0x38] sm:$0xff] }
  0x15   :  { %336 = vmatmul.mubr.msk.f32.vlgmr.msra.gmra.mrb[0].mxu0 %vm47_vm1, %v38_v3  ;;  %v377_v8 = vpack.c.bf16 %v123_v5, %v122_v4  ;;  %388 = vmatprep.subr.bf16.mxu0 %v431_v1  ;;  %v126_v10 = vld [vmem:[%s553_s3 + $0x20] sm:$0xff]  ;;  %v386_v15 = vpack.c.bf16 %v129_v14, %v128_v13  ;;  %v213_v17 = vld [vmem:[%s555_s5 + $0x8] sm:$0xff]  ;;  %v214_v18 = vld [vmem:[%s555_s5 + $0x10] sm:$0xff] }
  0x16   :  { %373 = vmatprep.mubr.msk.f32.mxu0 %vm430_vm0, %v429_v0  ;;  %v383_v12 = vpack.c.bf16 %v127_v11, %v126_v10  ;;  %v212_v16 = vld [vmem:[%s555_s5] sm:$0xff]  ;;  %v215_v20 = vld [vmem:[%s555_s5 + $0x18] sm:$0xff]  ;;  %v217_v23 = vld [vmem:[%s555_s5 + $0x28] sm:$0xff] }
  0x17   :  { %378 = vmatpush3.bf16.msra.mxu1 %v377_v8  ;;  %v389_v19 = vpack.c.bf16 %v213_v17, %v212_v16  ;;  %v392_v21 = vpack.c.bf16 %v215_v20, %v214_v18  ;;  %v216_v22 = vld [vmem:[%s555_s5 + $0x20] sm:$0xff]  ;;  %v218_v30 = vld [vmem:[%s555_s5 + $0x30] sm:$0xff]  ;;  %v219_v31 = vld [vmem:[%s555_s5 + $0x38] sm:$0xff] }
  0x18   :  { %379 = vmatprep.subr.bf16.mxu1 %v431_v1  ;;  %v395_v24 = vpack.c.bf16 %v217_v23, %v216_v22  ;;  %v307_v25 = vld [vmem:[%s552_s2] ss:$0 sm:$0xff]  ;;  %v398_v32 = vpack.c.bf16 %v219_v31, %v218_v30 }
  0x19   :  { %390 = vmatpush3.bf16.msra.mxu0 %v389_v19  ;;  %v309_v33 = vld [vmem:[%s554_s4] ss:$0 sm:$0xff] }
  0x1a   :  { %391 = vmatprep.subr.bf16.mxu0 %v431_v1  ;;  %v311_v38 = vld [vmem:[%s556_s6] ss:$0 sm:$0xff] }
  0x1b   :  { %381 = vmatpush3.bf16.msra.mxu1 %v380_v9 }
  0x1c   :  { %382 = vmatprep.subr.bf16.mxu1 %v431_v1 }
  0x1d   :  { %393 = vmatpush3.bf16.msra.mxu0 %v392_v21 }
  0x1e   :  { %394 = vmatprep.subr.bf16.mxu0 %v431_v1 }
  0x1f   :  { %384 = vmatpush3.bf16.msra.mxu1 %v383_v12 }
  0x20   :  { %385 = vmatprep.subr.bf16.mxu1 %v431_v1 }
  0x21   :  { %396 = vmatpush3.bf16.msra.mxu0 %v395_v24 }
  0x22   :  { %397 = vmatprep.subr.bf16.mxu0 %v431_v1 }
  0x23   :  { %387 = vmatpush3.bf16.msra.mxu1 %v386_v15 }
  0x25   :  { %399 = vmatpush3.bf16.msra.mxu0 %v398_v32 }
  0xe8   :  { %v117_v26 = vpop.f32.mrb[0].mxu0 }
  0xe9   :  { %v118_v27 = vadd.f32 %v307_v25, %v117_v26  ;;  %v337_v28 = vpop.f32.mrb[1].mxu0 }
  0xeb   :  { %v121_v29 = vmax.f32 %v118_v27, 0.0 }
  0xed   :  { %355 = vmatmul.mubr.msk.f32.vlgmr.msra.gmra.mrb[0].mxu1 %vm137_vm2, %v121_v29 }
 0x1c0   :  { %v207_v34 = vpop.f32.mrb[0].mxu1 }
 0x1c1   :  { %v208_v35 = vadd.f32 %v309_v33, %v207_v34  ;;  %v356_v36 = vpop.f32.mrb[1].mxu1 }
 0x1c3   :  { %v211_v37 = vmax.f32 %v208_v35, 0.0 }
 0x1c5   :  { %374 = vmatmul.mubr.msk.f32.vlgmr.msra.gmra.mrb[2].mxu0 %vm137_vm2, %v211_v37 }
 0x298   :  { %v296_v39 = vpop.f32.mrb[2].mxu0 }
 0x299   :  { %v297_v40 = vadd.f32 %v311_v38, %v296_v39  ;;  %v375_v41 = vpop.f32.mrb[3].mxu0 }
 0x29b   :  { %301 = vst.msk [vmem:[%s557_s7] sm:$0xff] %vm300_vm3, %v297_v40 }
 0x29c   :  { %306 = vsyncpa [#allocation3], 1 }

</bundles_post_ra>
